<compile_context>
chip_gen: v6e
topology: v6e:2x2x1
jax: 0.10.0
libtpu: 0.0.40
codegen_flags: <defaults>
</compile_context>

<pallas_src>
import jax
import jax.numpy as jnp
from jax.experimental import pallas as pl
from jax.experimental.pallas import tpu as pltpu


def init_weights_bias(size_in: int, size_out: int):
    """Deterministic parameter construction mirroring the PyTorch __init__."""
    block_size = size_out // 2
    rows = jnp.arange(size_out)
    part = rows // block_size                       # which input element each output row copies
    weights = (jnp.arange(size_in)[None, :] == part[:, None]).astype(jnp.float32)
    bias = (rows % block_size).astype(jnp.float32)  # 0..block_size-1 repeated per part
    return weights, bias


def occlusion_first_layer_kernel(x_ref, wt_ref, b_ref, o_ref):
    # x_ref : (size_in,)          f32, SMEM  (scalar reads)
    # wt_ref: (size_in, size_out) f32, VMEM  (transposed weights: each row is lane-major)
    # b_ref : (1, size_out)       f32, VMEM  (lane-dense bias row)
    # o_ref : (1, size_out)       f32, VMEM  (lane-dense output row)
    size_in = wt_ref.shape[0]
    acc = b_ref[...]                                # start from the bias row (VPU only)
    for k in range(size_in):                        # static unroll; size_in is tiny (4)
        acc = acc + wt_ref[pl.ds(k, 1), :] * x_ref[k]
    o_ref[...] = acc


def occlusion_first_layer(x, weights, bias):
    """x: (size_in,) float32 -> (size_out,) float32.  weights: (size_out, size_in)."""
    size_out, size_in = weights.shape
    w_t = jnp.asarray(weights, jnp.float32).T           # (size_in, size_out): lane-major rows
    x_sm = jnp.asarray(x, jnp.float32)                   # (size_in,) scalars -> SMEM
    b_row = jnp.asarray(bias, jnp.float32).reshape(1, size_out)

    out = pl.pallas_call(
        occlusion_first_layer_kernel,
        out_shape=jax.ShapeDtypeStruct((1, size_out), jnp.float32),
        in_specs=[
            pl.BlockSpec(memory_space=pltpu.MemorySpace.SMEM),   # x: scalars in SMEM
            pl.BlockSpec((size_in, size_out), lambda: (0, 0)),   # W^T: full-array VMEM block
            pl.BlockSpec((1, size_out), lambda: (0, 0)),         # bias row
        ],
        out_specs=pl.BlockSpec((1, size_out), lambda: (0, 0)),   # lane-dense output row
    )(x_sm, w_t, b_row)
    return out.reshape(size_out)


if __name__ == "__main__":
    # Small shapes consistent with the module: size_in=4 occlusion params,
    # size_out=32 (block_size=16).
    size_in, size_out = 4, 32

    weights, bias = init_weights_bias(size_in, size_out)

    key = jax.random.PRNGKey(0)
    x = jax.random.normal(key, (size_in,), dtype=jnp.float32)

    y = occlusion_first_layer(x, weights, bias)
    y = jax.block_until_ready(y)

    # Pure-JAX reference (same math as torch.matmul(weights, x) + bias).
    y_ref = jnp.matmul(weights, x) + bias
    assert y.shape == (size_out,)
    assert jnp.allclose(y, y_ref, atol=1e-6), (y, y_ref)

    print("KERNEL_OK")
</pallas_src>

<mosaic_0001>
module attributes {stable_mosaic.version = 11 : i64} {
  func.func @occlusion_first_layer_kernel(%arg0: memref<4xf32, #tpu.memory_space<smem>>, %arg1: memref<4x32xf32, #tpu.memory_space<vmem>>, %arg2: memref<1x32xf32, #tpu.memory_space<vmem>>, %arg3: memref<1x32xf32, #tpu.memory_space<vmem>>) attributes {dimension_semantics = [], scalar_prefetch = 0 : i64, scratch_operands = 0 : i64, tpu.core_type = #tpu.core_type<tc>} {
    %c0 = arith.constant 0 : index
    %c0_0 = arith.constant 0 : index
    %0 = vector.load %arg2[%c0, %c0_0] : memref<1x32xf32, #tpu.memory_space<vmem>>, vector<1x32xf32>
    %c0_1 = arith.constant 0 : index
    %c0_2 = arith.constant 0 : index
    %1 = vector.load %arg1[%c0_1, %c0_2] : memref<4x32xf32, #tpu.memory_space<vmem>>, vector<1x32xf32>
    %c0_3 = arith.constant 0 : index
    %2 = memref.load %arg0[%c0_3] : memref<4xf32, #tpu.memory_space<smem>>
    %3 = vector.broadcast %2 : f32 to vector<1x32xf32>
    %4 = arith.mulf %1, %3 : vector<1x32xf32>
    %5 = arith.addf %0, %4 : vector<1x32xf32>
    %c1 = arith.constant 1 : index
    %c0_4 = arith.constant 0 : index
    %6 = vector.load %arg1[%c1, %c0_4] : memref<4x32xf32, #tpu.memory_space<vmem>>, vector<1x32xf32>
    %c1_5 = arith.constant 1 : index
    %7 = memref.load %arg0[%c1_5] : memref<4xf32, #tpu.memory_space<smem>>
    %8 = vector.broadcast %7 : f32 to vector<1x32xf32>
    %9 = arith.mulf %6, %8 : vector<1x32xf32>
    %10 = arith.addf %5, %9 : vector<1x32xf32>
    %c2 = arith.constant 2 : index
    %c0_6 = arith.constant 0 : index
    %11 = vector.load %arg1[%c2, %c0_6] : memref<4x32xf32, #tpu.memory_space<vmem>>, vector<1x32xf32>
    %c2_7 = arith.constant 2 : index
    %12 = memref.load %arg0[%c2_7] : memref<4xf32, #tpu.memory_space<smem>>
    %13 = vector.broadcast %12 : f32 to vector<1x32xf32>
    %14 = arith.mulf %11, %13 : vector<1x32xf32>
    %15 = arith.addf %10, %14 : vector<1x32xf32>
    %c3 = arith.constant 3 : index
    %c0_8 = arith.constant 0 : index
    %16 = vector.load %arg1[%c3, %c0_8] : memref<4x32xf32, #tpu.memory_space<vmem>>, vector<1x32xf32>
    %c3_9 = arith.constant 3 : index
    %17 = memref.load %arg0[%c3_9] : memref<4xf32, #tpu.memory_space<smem>>
    %18 = vector.broadcast %17 : f32 to vector<1x32xf32>
    %19 = arith.mulf %16, %18 : vector<1x32xf32>
    %20 = arith.addf %15, %19 : vector<1x32xf32>
    %c0_10 = arith.constant 0 : index
    %c0_11 = arith.constant 0 : index
    %21 = vector.load %arg3[%c0_10, %c0_11] : memref<1x32xf32, #tpu.memory_space<vmem>>, vector<1x32xf32>
    tpu.vector_store %arg3[%c0_10, %c0_11], %20 {strides = array<i32>} : memref<1x32xf32, #tpu.memory_space<vmem>>, vector<1x32xf32>,
    return
  }
}

</mosaic_0001>

<bundles_post_ra>
// kernel: tpu_custom_call.1
= control target key start
LH: loop header
LB: loop body
LE: loop exit
PB: predicated region body
PF: predicated region fallthrough
CT: control target
= control target key end

     0   :  { %8 = vsyncpa [#allocation5], 0  ;;  %s172_s0 = inlined_call_operand.hbm [shape: f32[4], index: 0, kind: input, shape index: {}]   ;;  %s173_s1 = inlined_call_operand.hbm [shape: f32[4,32], index: 1, kind: input, shape index: {}]   ;;  %s174_s2 = inlined_call_operand.vmem [shape: f32[1,32], index: 2, kind: input, shape index: {}]   ;;  %s175_s3 = inlined_call_operand.hbm [shape: f32[1,32], index: 3, kind: output, shape index: {}]  }
   0x1   :  { %9 = vsyncpa [#allocation3], 0 }
   0x2   :  { %10 = vsyncpa [#allocation4], 0  ;;  %s137_s12 = smov [#allocation2]   ;;  %s138_s15 = smov [#allocation6]  }
   0x3   :  { %18 = dma.hbm_to_smem %s172_s0, 16, %s137_s12, [#allocation5]  }
   0x4   :  { %s25_s16 = sshll.u32 %s138_s15, 4  ;;  %s26_s16 = int_to_ptr.vmem [resolvable:$true] %s25_s16 }
   0x5   :  { %s99_s17 = scalar_lea.vmem %s26_s16, 64  ;;  %p104_p1 = scmp.lt.s32.totalorder %s26_s16, %s26_s16 }
   0x6   :  { %p100_p0 = scmp.ne.s32.totalorder %s26_s16, %s99_s17  ;;  %p105_p2 = scmp.lt.s32.totalorder %s99_s17, %s99_s17 }
   0x8   :  { %p106_p3 = por %p105_p2, %p104_p1 }
   0xa   :  { %p107_p4 = pnand %p106_p3, %p100_p0 }
   0xc   :  { %110 = shalt.err (!%p107_p4)
}
   0xd   :  { %28 = dma.hbm_to_vmem [thread:$0]  %s173_s1, 64, %s26_s16, [#allocation3]  }
   0xe   :  { %131 = dma.done.wait [#allocation5], 16  }
   0xf   :  { %132 = vsyncadd [#allocation5], 4294967280 }
  0x10   :  { %133 = dma.done.wait [#allocation3], 64  }
  0x11   :  { %134 = vsyncadd [#allocation3], 4294967232 }
  0x12   :  { %37 = sfence }
  0x13   :  { %s40_s0 = sld [smem:[#allocation2]]  ;;  %v39_v0 = vld [vmem:[#allocation6] sm:$0x1]  ;;  %v44_v1 = vld [vmem:[#allocation6 + $0x1] sm:$0x1]  ;;  %s139_s1 = smov [#allocation7]  }
  0x14   :  { %s77_s20 = sld [smem:[#allocation2 + $0x1]]  ;;  %v38_v2 = vld [vmem:[%s174_s2] sm:$0x1]  ;;  %v49_v4 = vld [vmem:[#allocation6 + $0x2] sm:$0x1]  ;;  %s67_s25 = sshll.u32 %s139_s1, 4  ;;  %s68_s25 = int_to_ptr.vmem [resolvable:$true] %s67_s25 }
  0x15   :  { %s78_s21 = sld [smem:[#allocation2 + $0x2]]  ;;  %v54_v9 = vld [vmem:[#allocation6 + $0x3] sm:$0x1]  ;;  %vm59_vm0 = vcmask 253952   ;;  %s111_s2 = scalar_lea.vmem %s68_s25, 16 }
  0x16   :  { %s79_s22 = sld [smem:[#allocation2 + $0x3]]  ;;  %p112_p5 = scmp.ne.s32.totalorder %s68_s25, %s111_s2 }
  0x17   :  { %s115_s26 = scalar_lea.vmem %s68_s25, 32  ;;  %p116_p6 = scmp.lt.s32.totalorder %s68_s25, %s68_s25 }
  0x18   :  { %p117_p7 = scmp.lt.s32.totalorder %s115_s26, %s111_s2 }
  0x19   :  { %v41_v3 = vstv %s40_s0 }
  0x1a   :  { %v42_v5 = vmul.f32 %v41_v3, %v39_v0  ;;  %v46_v6 = vstv %s77_s20  ;;  %p118_p8 = por %p117_p7, %p116_p6 }
  0x1b   :  { %v47_v7 = vmul.f32 %v46_v6, %v44_v1  ;;  %v51_v8 = vstv %s78_s21 }
  0x1c   :  { %v43_v10 = vadd.f32 %v42_v5, %v38_v2  ;;  %v52_v11 = vmul.f32 %v51_v8, %v49_v4  ;;  %v56_v12 = vstv %s79_s22  ;;  %p119_p9 = pnand %p118_p8, %p112_p5 }
  0x1d   :  { %v57_v14 = vmul.f32 %v56_v12, %v54_v9 }
  0x1e   :  { %v48_v13 = vadd.f32 %v47_v7, %v43_v10 }
  0x20   :  { %v53_v15 = vadd.f32 %v52_v11, %v48_v13 }
  0x22   :  { %v58_v16 = vadd.f32 %v57_v14, %v53_v15 }
  0x24   :  { %60 = vst.msk [vmem:[#allocation7] sm:$0x1] %vm59_vm0, %v58_v16 }
  0x25   :  { %122 = shalt.err (!%p119_p9)
}
  0x26   :  { %70 = dma.vmem_to_hbm [thread:$0]  %s68_s25, 16, %s175_s3, [#allocation4]  }
  0x27   :  { %135 = dma.done.wait [#allocation4], 16  }
  0x28   :  { %136 = vsyncadd [#allocation4], 4294967280 }
  0x29   :  { %74 = vsyncpa [#allocation3], 1 }
  0x2a   :  { %75 = vsyncpa [#allocation4], 1 }
  0x2b   :  { %76 = vsyncpa [#allocation5], 1 }

</bundles_post_ra>
